<compile_context>
chip_gen: v5e
topology: v5e:2x2
jax: 0.10.0
libtpu: 0.0.40
codegen_flags: <defaults>
</compile_context>

<pallas_src>
import functools

import jax
import jax.numpy as jnp
from jax import lax
from jax.experimental import pallas as pl
from jax.experimental.pallas import tpu as pltpu

_MAX_UNROLL = 8      # fully unroll the Sinkhorn loop up to this many iterations
_MXU_MIN_DIM = 256   # route the per-iteration matvecs through the MXU above this


def _sinkhorn_kernel(x_ref, out_ref, *, num_iters, epsilon, b, k, use_mxu):
    """out = SinkhornKnopp(num_iters, epsilon)(x), in [B, K] layout."""
    inv_eps = 1.0 / float(epsilon)

    x = x_ref[...].astype(jnp.float32)
    # Global-max shift: the final Q is invariant to a global scale of
    # exp(x/eps) (it cancels in the first normalization), so this is an exact
    # no-op mathematically, but it keeps exp() finite where the torch
    # reference overflows f32 for |logit| > ~4 at epsilon = 0.05.
    k0 = jnp.exp((x - jnp.max(x)) * inv_eps)
    # K0 lives in the output block; read-only during the iterations, rewritten
    # exactly once at the end (keeps peak VMEM to ~ input + output blocks).
    out_ref[...] = k0

    if num_iters == 0:
        # Reference: Q = (K0 / sum(K0)) * B.
        out_ref[...] = out_ref[...] * (float(b) / jnp.sum(out_ref[...]))
        return

    def col_sums(r):
        # (1, K): per-prototype sums of r * K0   (torch: sum over dim=1 of Q).
        q = out_ref[...]
        if use_mxu:
            return lax.dot_general(r, q, (((0,), (0,)), ((), ())),
                                   preferred_element_type=jnp.float32)
        return jnp.sum(q * r, axis=0, keepdims=True)

    def row_sums(c):
        # (B, 1): per-sample sums of K0 * c     (torch: sum over dim=0 of Q).
        q = out_ref[...]
        if use_mxu:
            return lax.dot_general(q, c, (((1,), (1,)), ((), ())),
                                   preferred_element_type=jnp.float32)
        return jnp.sum(q * c, axis=1, keepdims=True)

    # Exact divisions: they only touch (B,) / (K,) vectors now, so exact 1/x
    # is essentially free and matches torch's exact divides more closely than
    # approximate EUP reciprocals.
    def c_update(r):
        return 1.0 / (float(k) * col_sums(r))

    r = jnp.ones((b, 1), jnp.float32)
    if num_iters <= _MAX_UNROLL:
        for it in range(num_iters):
            c = c_update(r)
            rs = row_sums(c)
            # Last iteration: the trailing `Q *= B` cancels this /B exactly.
            r = 1.0 / rs if it == num_iters - 1 else 1.0 / (float(b) * rs)
    else:
        def body(_, rr):
            return 1.0 / (float(b) * row_sums(c_update(rr)))
        r = lax.fori_loop(0, num_iters - 1, body, r,
                          unroll=min(_MAX_UNROLL, num_iters - 1))
        c = c_update(r)
        r = 1.0 / row_sums(c)

    # Single full-tile materialization: Q = r * K0 * c.
    out_ref[...] = out_ref[...] * r * c


def _vmem_cap_bytes():
    try:
        return int(pltpu.get_tpu_info().vmem_capacity_bytes)
    except Exception:
        return 128 << 20   # conservative fallback (v5e/v6e physical VMEM)


def sinkhorn_knopp(logits: jax.Array, num_iters: int = 3,
                   epsilon: float = 0.05) -> jax.Array:
    """Pallas TPU implementation of SinkhornKnopp.forward.

    logits: [B, K] float array (any float dtype). Returns [B, K] float32,
    equal to the PyTorch module's output.
    """
    B, K = logits.shape
    use_mxu = min(B, K) >= _MXU_MIN_DIM

    in_bytes = B * K * jnp.dtype(logits.dtype).itemsize
    out_bytes = B * K * 4
    # Per-generation VMEM budget: ~90% of physical capacity, at least the
    # default scoped limit, and no more than this kernel can actually use.
    vmem_limit = max(32 << 20,
                     min(int(_vmem_cap_bytes() * 0.9),
                         2 * (in_bytes + out_bytes) + (4 << 20)))

    kernel = functools.partial(_sinkhorn_kernel,
                               num_iters=int(num_iters),
                               epsilon=float(epsilon),
                               b=B, k=K, use_mxu=use_mxu)

    # Single-tile, grid-less kernel: fine for SwAV-head sizes that fit VMEM.
    # (See TODOs in the header for the streamed / multi-core variant.)
    return pl.pallas_call(
        kernel,
        out_shape=jax.ShapeDtypeStruct((B, K), jnp.float32),
        in_specs=[pl.BlockSpec((B, K), lambda: (0, 0))],
        out_specs=pl.BlockSpec((B, K), lambda: (0, 0)),
        compiler_params=pltpu.CompilerParams(vmem_limit_bytes=vmem_limit),
    )(logits)


def _reference(logits, num_iters=3, epsilon=0.05):
    # Pure-JAX transcription of the PyTorch module (with its transposes).
    Q = jnp.exp(logits.astype(jnp.float32) / epsilon).T
    K, B = Q.shape
    Q = Q / jnp.sum(Q)
    for _ in range(num_iters):
        Q = Q / jnp.sum(Q, axis=1, keepdims=True)
        Q = Q / K
        Q = Q / jnp.sum(Q, axis=0, keepdims=True)
        Q = Q / B
    Q = Q * B
    return Q.T


def _check(logits, num_iters, epsilon, tol=5e-3):
    out = jax.block_until_ready(sinkhorn_knopp(logits, num_iters, epsilon))
    ref = _reference(logits, num_iters, epsilon)
    assert out.shape == logits.shape
    assert bool(jnp.isfinite(out).all()), "non-finite output"
    rel = float(jnp.max(jnp.abs(out - ref) / (jnp.abs(ref) + 1e-12)))
    assert rel < tol, f"mismatch vs reference: max rel err {rel}"


if __name__ == "__main__":
    key = jax.random.PRNGKey(0)
    k1, k2 = jax.random.split(key)

    # Small SwAV-like head: batch=8, num_prototypes=32.
    logits_small = jax.random.normal(k1, (8, 32), dtype=jnp.float32)
    _check(logits_small, num_iters=3, epsilon=0.05)

    # Ragged K (not a multiple of 128): exercises the unpadded full-array
    # BlockSpec path (no wrapper pad/slice).
    logits_ragged = jax.random.normal(k2, (16, 200), dtype=jnp.float32)
    _check(logits_ragged, num_iters=3, epsilon=0.05)

    # num_iters == 0 path (global normalization only).
    _check(logits_small, num_iters=0, epsilon=0.05)

    print("KERNEL_OK")
</pallas_src>

<mosaic_0001>
module attributes {stable_mosaic.version = 11 : i64} {
  func.func @_sinkhorn_kernel(%arg0: memref<8x32xf32, #tpu.memory_space<vmem>>, %arg1: memref<8x32xf32, #tpu.memory_space<vmem>>) attributes {dimension_semantics = [], scalar_prefetch = 0 : i64, scratch_operands = 0 : i64, tpu.core_type = #tpu.core_type<tc>} {
    %c0 = arith.constant 0 : index
    %c0_0 = arith.constant 0 : index
    %0 = vector.load %arg0[%c0, %c0_0] : memref<8x32xf32, #tpu.memory_space<vmem>>, vector<8x32xf32>
    %1 = vector.shape_cast %0 : vector<8x32xf32> to vector<1x8x32xf32>
    %cst = arith.constant dense<0xFF800000> : vector<1xf32>
    %2 = vector.multi_reduction <maximumf>, %1, %cst [1, 2] : vector<1x8x32xf32> to vector<1xf32>
    %3 = vector.shape_cast %2 : vector<1xf32> to vector<1x1x1xf32>
    %4 = vector.extract %3[0, 0, 0] : f32 from vector<1x1x1xf32>
    %5 = vector.broadcast %4 : f32 to vector<8x32xf32>
    %6 = arith.subf %0, %5 : vector<8x32xf32>
    %cst_1 = arith.constant 2.000000e+01 : f32
    %7 = vector.broadcast %cst_1 : f32 to vector<8x32xf32>
    %8 = arith.mulf %6, %7 : vector<8x32xf32>
    %9 = math.exp %8 : vector<8x32xf32>
    %c0_2 = arith.constant 0 : index
    %c0_3 = arith.constant 0 : index
    %10 = vector.load %arg1[%c0_2, %c0_3] : memref<8x32xf32, #tpu.memory_space<vmem>>, vector<8x32xf32>
    tpu.vector_store %arg1[%c0_2, %c0_3], %9 {strides = array<i32>} : memref<8x32xf32, #tpu.memory_space<vmem>>, vector<8x32xf32>,
    %cst_4 = arith.constant 1.000000e+00 : f32
    %11 = vector.broadcast %cst_4 : f32 to vector<8x1xf32>
    %c0_5 = arith.constant 0 : index
    %c0_6 = arith.constant 0 : index
    %12 = vector.load %arg1[%c0_5, %c0_6] : memref<8x32xf32, #tpu.memory_space<vmem>>, vector<8x32xf32>
    %13 = vector.broadcast %11 : vector<8x1xf32> to vector<8x32xf32>
    %14 = arith.mulf %12, %13 : vector<8x32xf32>
    %cst_7 = arith.constant dense<0.000000e+00> : vector<32xf32>
    %15 = vector.multi_reduction <add>, %14, %cst_7 [0] : vector<8x32xf32> to vector<32xf32>
    %16 = vector.shape_cast %15 : vector<32xf32> to vector<1x32xf32>
    %cst_8 = arith.constant 3.200000e+01 : f32
    %17 = vector.broadcast %cst_8 : f32 to vector<1x32xf32>
    %18 = arith.mulf %17, %16 : vector<1x32xf32>
    %cst_9 = arith.constant 1.000000e+00 : f32
    %19 = vector.broadcast %cst_9 : f32 to vector<1x32xf32>
    %20 = arith.divf %19, %18 : vector<1x32xf32>
    %c0_10 = arith.constant 0 : index
    %c0_11 = arith.constant 0 : index
    %21 = vector.load %arg1[%c0_10, %c0_11] : memref<8x32xf32, #tpu.memory_space<vmem>>, vector<8x32xf32>
    %22 = vector.broadcast %20 : vector<1x32xf32> to vector<8x32xf32>
    %23 = arith.mulf %21, %22 : vector<8x32xf32>
    %cst_12 = arith.constant dense<0.000000e+00> : vector<8xf32>
    %24 = vector.multi_reduction <add>, %23, %cst_12 [1] : vector<8x32xf32> to vector<8xf32>
    %25 = vector.shape_cast %24 : vector<8xf32> to vector<8x1xf32>
    %cst_13 = arith.constant 8.000000e+00 : f32
    %26 = vector.broadcast %cst_13 : f32 to vector<8x1xf32>
    %27 = arith.mulf %26, %25 : vector<8x1xf32>
    %cst_14 = arith.constant 1.000000e+00 : f32
    %28 = vector.broadcast %cst_14 : f32 to vector<8x1xf32>
    %29 = arith.divf %28, %27 : vector<8x1xf32>
    %c0_15 = arith.constant 0 : index
    %c0_16 = arith.constant 0 : index
    %30 = vector.load %arg1[%c0_15, %c0_16] : memref<8x32xf32, #tpu.memory_space<vmem>>, vector<8x32xf32>
    %31 = vector.broadcast %29 : vector<8x1xf32> to vector<8x32xf32>
    %32 = arith.mulf %30, %31 : vector<8x32xf32>
    %cst_17 = arith.constant dense<0.000000e+00> : vector<32xf32>
    %33 = vector.multi_reduction <add>, %32, %cst_17 [0] : vector<8x32xf32> to vector<32xf32>
    %34 = vector.shape_cast %33 : vector<32xf32> to vector<1x32xf32>
    %cst_18 = arith.constant 3.200000e+01 : f32
    %35 = vector.broadcast %cst_18 : f32 to vector<1x32xf32>
    %36 = arith.mulf %35, %34 : vector<1x32xf32>
    %cst_19 = arith.constant 1.000000e+00 : f32
    %37 = vector.broadcast %cst_19 : f32 to vector<1x32xf32>
    %38 = arith.divf %37, %36 : vector<1x32xf32>
    %c0_20 = arith.constant 0 : index
    %c0_21 = arith.constant 0 : index
    %39 = vector.load %arg1[%c0_20, %c0_21] : memref<8x32xf32, #tpu.memory_space<vmem>>, vector<8x32xf32>
    %40 = vector.broadcast %38 : vector<1x32xf32> to vector<8x32xf32>
    %41 = arith.mulf %39, %40 : vector<8x32xf32>
    %cst_22 = arith.constant dense<0.000000e+00> : vector<8xf32>
    %42 = vector.multi_reduction <add>, %41, %cst_22 [1] : vector<8x32xf32> to vector<8xf32>
    %43 = vector.shape_cast %42 : vector<8xf32> to vector<8x1xf32>
    %cst_23 = arith.constant 8.000000e+00 : f32
    %44 = vector.broadcast %cst_23 : f32 to vector<8x1xf32>
    %45 = arith.mulf %44, %43 : vector<8x1xf32>
    %cst_24 = arith.constant 1.000000e+00 : f32
    %46 = vector.broadcast %cst_24 : f32 to vector<8x1xf32>
    %47 = arith.divf %46, %45 : vector<8x1xf32>
    %c0_25 = arith.constant 0 : index
    %c0_26 = arith.constant 0 : index
    %48 = vector.load %arg1[%c0_25, %c0_26] : memref<8x32xf32, #tpu.memory_space<vmem>>, vector<8x32xf32>
    %49 = vector.broadcast %47 : vector<8x1xf32> to vector<8x32xf32>
    %50 = arith.mulf %48, %49 : vector<8x32xf32>
    %cst_27 = arith.constant dense<0.000000e+00> : vector<32xf32>
    %51 = vector.multi_reduction <add>, %50, %cst_27 [0] : vector<8x32xf32> to vector<32xf32>
    %52 = vector.shape_cast %51 : vector<32xf32> to vector<1x32xf32>
    %cst_28 = arith.constant 3.200000e+01 : f32
    %53 = vector.broadcast %cst_28 : f32 to vector<1x32xf32>
    %54 = arith.mulf %53, %52 : vector<1x32xf32>
    %cst_29 = arith.constant 1.000000e+00 : f32
    %55 = vector.broadcast %cst_29 : f32 to vector<1x32xf32>
    %56 = arith.divf %55, %54 : vector<1x32xf32>
    %c0_30 = arith.constant 0 : index
    %c0_31 = arith.constant 0 : index
    %57 = vector.load %arg1[%c0_30, %c0_31] : memref<8x32xf32, #tpu.memory_space<vmem>>, vector<8x32xf32>
    %58 = vector.broadcast %56 : vector<1x32xf32> to vector<8x32xf32>
    %59 = arith.mulf %57, %58 : vector<8x32xf32>
    %cst_32 = arith.constant dense<0.000000e+00> : vector<8xf32>
    %60 = vector.multi_reduction <add>, %59, %cst_32 [1] : vector<8x32xf32> to vector<8xf32>
    %61 = vector.shape_cast %60 : vector<8xf32> to vector<8x1xf32>
    %cst_33 = arith.constant 1.000000e+00 : f32
    %62 = vector.broadcast %cst_33 : f32 to vector<8x1xf32>
    %63 = arith.divf %62, %61 : vector<8x1xf32>
    %c0_34 = arith.constant 0 : index
    %c0_35 = arith.constant 0 : index
    %64 = vector.load %arg1[%c0_34, %c0_35] : memref<8x32xf32, #tpu.memory_space<vmem>>, vector<8x32xf32>
    %65 = vector.broadcast %63 : vector<8x1xf32> to vector<8x32xf32>
    %66 = arith.mulf %64, %65 : vector<8x32xf32>
    %67 = vector.broadcast %56 : vector<1x32xf32> to vector<8x32xf32>
    %68 = arith.mulf %66, %67 : vector<8x32xf32>
    %c0_36 = arith.constant 0 : index
    %c0_37 = arith.constant 0 : index
    %69 = vector.load %arg1[%c0_36, %c0_37] : memref<8x32xf32, #tpu.memory_space<vmem>>, vector<8x32xf32>
    tpu.vector_store %arg1[%c0_36, %c0_37], %68 {strides = array<i32>} : memref<8x32xf32, #tpu.memory_space<vmem>>, vector<8x32xf32>,
    return
  }
}

</mosaic_0001>

<bundles_post_ra>
// kernel: tpu_custom_call.1
= control target key start
LH: loop header
LB: loop body
LE: loop exit
PB: predicated region body
PF: predicated region fallthrough
CT: control target
= control target key end

     0   :  { %6 = vsyncpa [#allocation3], 0  ;;  %s298_s0 = inlined_call_operand.hbm [shape: f32[8,32], index: 0, kind: input, shape index: {}]   ;;  %s299_s1 = inlined_call_operand.hbm [shape: f32[8,32], index: 1, kind: output, shape index: {}]  }
   0x1   :  { %7 = vsyncpa [#allocation4], 0  ;;  %s13_s8 = sshll.u32 %s298_s0, 4  ;;  %s262_s9 = smov [#allocation2]   ;;  %s14_s8 = int_to_ptr.hbm [resolvable:$true] %s13_s8 }
   0x2   :  { %s15_s10 = sshll.u32 %s262_s9, 4  ;;  %s16_s10 = int_to_ptr.vmem [resolvable:$true] %s15_s10 }
   0x3   :  { %18 = dma.hbm_to_vmem [thread:$0]  %s14_s8, 128, %s16_s10, [#allocation3]  }
   0x4   :  { %258 = dma.done.wait [#allocation3], 128  }
   0x5   :  { %259 = vsyncadd [#allocation3], 4294967168  ;;  %vm24_vm0 = vcmask 261120   ;;  %v23_v0 = vld [vmem:[#allocation2] sm:$0xff]  ;;  %s263_s11 = smov [#allocation5]   ;;  %s182_s15 = sshll.u32 %s299_s1, 4  ;;  %s183_s15 = int_to_ptr.hbm [resolvable:$true] %s182_s15 }
   0x6   :  { %v25_v1 = vsel %vm24_vm0, %v23_v0, -inf  ;;  %s180_s12 = sshll.u32 %s263_s11, 4  ;;  %s181_s12 = int_to_ptr.vmem [resolvable:$true] %s180_s12 }
   0x7   :  { %26 = vmax.xlane.f32.xlu0 %v25_v1 }
  0x7a   :  { %v27_v2 = vpop.xlane.xlu0 %26 }
  0x7b   :  { %v28_v3 = vrot.slane %v27_v2, 4 }
  0x7d   :  { %v29_v4 = vmax.f32 %v27_v2, %v28_v3 }
  0x7f   :  { %v30_v5 = vrot.slane %v29_v4, 2 }
  0x81   :  { %v31_v6 = vmax.f32 %v29_v4, %v30_v5 }
  0x83   :  { %v32_v7 = vrot.slane %v31_v6, 1 }
  0x85   :  { %v33_v8 = vmax.f32 %v31_v6, %v32_v7 }
  0x87   :  { %192 = vpush %v33_v8 }
  0xb8   :  { %s193_s0 = spop %192 }
  0xb9   :  { %v35_v9 = vstv %s193_s0 }
  0xba   :  { %v36_v10 = vsub.f32 %v23_v0, %v35_v9 }
  0xbc   :  { %v37_v11 = vmul.f32 20.0, %v36_v10 }
  0xbe   :  { %v38_v12 = vmul.f32 1.442695, %v37_v11 }
  0xc0   :  { %196 = vpow2.f32 %v38_v12 }
  0xc6   :  { %v197_v13 = vpop.eup %196 }
  0xc7   :  { %40 = vst.msk [vmem:[#allocation5] sm:$0xff] %vm24_vm0, %v197_v13 }
  0xce   :  { %v279_v14 = vld [vmem:[#allocation5] sm:$0xff] }
  0xcf   :  { %v42_v15 = vsel %vm24_vm0, %v279_v14, 0.0 }
  0xd0   :  { %v43_v16 = vrot.slane %v42_v15, 4 }
  0xd2   :  { %v44_v17 = vadd.f32 %v43_v16, %v42_v15 }
  0xd4   :  { %v45_v18 = vrot.slane %v44_v17, 2 }
  0xd6   :  { %v46_v19 = vadd.f32 %v45_v18, %v44_v17 }
  0xd8   :  { %v47_v20 = vrot.slane %v46_v19, 1 }
  0xda   :  { %v48_v21 = vadd.f32 %v47_v20, %v46_v19 }
  0xdc   :  { %v49_v22 = vmul.f32 32.0, %v48_v21 }
  0xde   :  { %198 = vrcp.f32 %v49_v22  ;;  %v61_v26 = vand.u32 2147483648, %v49_v22  ;;  %v59_v28 = vand.u32 2147483647, %v49_v22  ;;  %vm55_vm2 = vweird.f32 %v49_v22 }
  0xe0   :  { %v62_v30 = vor.u32 1.1754944e-38, %v61_v26  ;;  %vm60_vm4 = vcmp.eq.f32.partialorder %v59_v28, 8.507059e+37 }
  0xe4   :  { %v199_v23 = vpop.eup %198 }
  0xe5   :  { %v51_v24 = vmul.f32 %v199_v23, %v49_v22  ;;  %vm56_vm1 = vweird.f32 %v199_v23 }
  0xe6   :  { %vm57_vm3 = vmor %vm55_vm2, %vm56_vm1 }
  0xe7   :  { %v52_v25 = vsub.f32 1.0, %v51_v24 }
  0xe9   :  { %v53_v27 = vmul.f32 %v199_v23, %v52_v25 }
  0xeb   :  { %v54_v29 = vadd.f32 %v199_v23, %v53_v27 }
  0xed   :  { %v58_v31 = vsel %vm57_vm3, %v199_v23, %v54_v29 }
  0xee   :  { %v63_v32 = vsel %vm60_vm4, %v62_v30, %v58_v31 }
  0xef   :  { %v65_v33 = vmul.f32 %v63_v32, %v279_v14 }
  0xf1   :  { %v66_v34 = vsel %vm24_vm0, %v65_v33, 0.0 }
  0xf2   :  { %67 = vadd.xlane.f32.xlu0 %v66_v34 }
 0x165   :  { %v68_v35 = vpop.xlane.xlu0 %67 }
 0x166   :  { %v69_v36 = vmul.f32 8.0, %v68_v35 }
 0x168   :  { %200 = vrcp.f32 %v69_v36  ;;  %v81_v40 = vand.u32 2147483648, %v69_v36  ;;  %v79_v42 = vand.u32 2147483647, %v69_v36  ;;  %vm75_vm6 = vweird.f32 %v69_v36 }
 0x16a   :  { %v82_v44 = vor.u32 1.1754944e-38, %v81_v40  ;;  %vm80_vm8 = vcmp.eq.f32.partialorder %v79_v42, 8.507059e+37 }
 0x16e   :  { %v201_v37 = vpop.eup %200 }
 0x16f   :  { %v71_v38 = vmul.f32 %v201_v37, %v69_v36  ;;  %vm76_vm5 = vweird.f32 %v201_v37 }
 0x170   :  { %vm77_vm7 = vmor %vm75_vm6, %vm76_vm5 }
 0x171   :  { %v72_v39 = vsub.f32 1.0, %v71_v38 }
 0x173   :  { %v73_v41 = vmul.f32 %v201_v37, %v72_v39 }
 0x175   :  { %v74_v43 = vadd.f32 %v201_v37, %v73_v41 }
 0x177   :  { %v78_v45 = vsel %vm77_vm7, %v201_v37, %v74_v43 }
 0x178   :  { %v83_v46 = vsel %vm80_vm8, %v82_v44, %v78_v45 }
 0x179   :  { %v85_v47 = vmul.f32 %v83_v46, %v279_v14 }
 0x17b   :  { %v86_v48 = vsel %vm24_vm0, %v85_v47, 0.0 }
 0x17c   :  { %v87_v49 = vrot.slane %v86_v48, 4 }
 0x17e   :  { %v88_v50 = vadd.f32 %v87_v49, %v86_v48 }
 0x180   :  { %v89_v51 = vrot.slane %v88_v50, 2 }
 0x182   :  { %v90_v52 = vadd.f32 %v89_v51, %v88_v50 }
 0x184   :  { %v91_v53 = vrot.slane %v90_v52, 1 }
 0x186   :  { %v92_v54 = vadd.f32 %v91_v53, %v90_v52 }
 0x188   :  { %v93_v55 = vmul.f32 32.0, %v92_v54 }
 0x18a   :  { %202 = vrcp.f32 %v93_v55  ;;  %v105_v59 = vand.u32 2147483648, %v93_v55  ;;  %v103_v61 = vand.u32 2147483647, %v93_v55  ;;  %vm99_vm10 = vweird.f32 %v93_v55 }
 0x18c   :  { %v106_v63 = vor.u32 1.1754944e-38, %v105_v59  ;;  %vm104_vm12 = vcmp.eq.f32.partialorder %v103_v61, 8.507059e+37 }
 0x190   :  { %v203_v56 = vpop.eup %202 }
 0x191   :  { %v95_v57 = vmul.f32 %v203_v56, %v93_v55  ;;  %vm100_vm9 = vweird.f32 %v203_v56 }
 0x192   :  { %vm101_vm11 = vmor %vm99_vm10, %vm100_vm9 }
 0x193   :  { %v96_v58 = vsub.f32 1.0, %v95_v57 }
 0x195   :  { %v97_v60 = vmul.f32 %v203_v56, %v96_v58 }
 0x197   :  { %v98_v62 = vadd.f32 %v203_v56, %v97_v60 }
 0x199   :  { %v102_v0 = vsel %vm101_vm11, %v203_v56, %v98_v62 }
 0x19a   :  { %v107_v1 = vsel %vm104_vm12, %v106_v63, %v102_v0 }
 0x19b   :  { %v109_v2 = vmul.f32 %v107_v1, %v279_v14 }
 0x19d   :  { %v110_v3 = vsel %vm24_vm0, %v109_v2, 0.0 }
 0x19e   :  { %111 = vadd.xlane.f32.xlu1 %v110_v3 }
 0x211   :  { %v112_v4 = vpop.xlane.xlu1 %111 }
 0x212   :  { %v113_v5 = vmul.f32 8.0, %v112_v4 }
 0x214   :  { %204 = vrcp.f32 %v113_v5  ;;  %v125_v9 = vand.u32 2147483648, %v113_v5  ;;  %v123_v11 = vand.u32 2147483647, %v113_v5  ;;  %vm119_vm14 = vweird.f32 %v113_v5 }
 0x216   :  { %v126_v13 = vor.u32 1.1754944e-38, %v125_v9  ;;  %vm124_vm1 = vcmp.eq.f32.partialorder %v123_v11, 8.507059e+37 }
 0x21a   :  { %v205_v6 = vpop.eup %204 }
 0x21b   :  { %v115_v7 = vmul.f32 %v205_v6, %v113_v5  ;;  %vm120_vm13 = vweird.f32 %v205_v6 }
 0x21c   :  { %vm121_vm15 = vmor %vm119_vm14, %vm120_vm13 }
 0x21d   :  { %v116_v8 = vsub.f32 1.0, %v115_v7 }
 0x21f   :  { %v117_v10 = vmul.f32 %v205_v6, %v116_v8 }
 0x221   :  { %v118_v12 = vadd.f32 %v205_v6, %v117_v10 }
 0x223   :  { %v122_v15 = vsel %vm121_vm15, %v205_v6, %v118_v12 }
 0x224   :  { %v127_v16 = vsel %vm124_vm1, %v126_v13, %v122_v15 }
 0x225   :  { %v129_v17 = vmul.f32 %v127_v16, %v279_v14 }
 0x227   :  { %v130_v18 = vsel %vm24_vm0, %v129_v17, 0.0 }
 0x228   :  { %v131_v19 = vrot.slane %v130_v18, 4 }
 0x22a   :  { %v132_v20 = vadd.f32 %v131_v19, %v130_v18 }
 0x22c   :  { %v133_v21 = vrot.slane %v132_v20, 2 }
 0x22e   :  { %v134_v22 = vadd.f32 %v133_v21, %v132_v20 }
 0x230   :  { %v135_v23 = vrot.slane %v134_v22, 1 }
 0x232   :  { %v136_v24 = vadd.f32 %v135_v23, %v134_v22 }
 0x234   :  { %v137_v25 = vmul.f32 32.0, %v136_v24 }
 0x236   :  { %206 = vrcp.f32 %v137_v25  ;;  %v149_v29 = vand.u32 2147483648, %v137_v25  ;;  %v147_v31 = vand.u32 2147483647, %v137_v25  ;;  %vm143_vm3 = vweird.f32 %v137_v25 }
 0x238   :  { %v150_v33 = vor.u32 1.1754944e-38, %v149_v29  ;;  %vm148_vm5 = vcmp.eq.f32.partialorder %v147_v31, 8.507059e+37 }
 0x23c   :  { %v207_v26 = vpop.eup %206 }
 0x23d   :  { %v139_v27 = vmul.f32 %v207_v26, %v137_v25  ;;  %vm144_vm2 = vweird.f32 %v207_v26 }
 0x23e   :  { %vm145_vm4 = vmor %vm143_vm3, %vm144_vm2 }
 0x23f   :  { %v140_v28 = vsub.f32 1.0, %v139_v27 }
 0x241   :  { %v141_v30 = vmul.f32 %v207_v26, %v140_v28 }
 0x243   :  { %v142_v32 = vadd.f32 %v207_v26, %v141_v30 }
 0x245   :  { %v146_v34 = vsel %vm145_vm4, %v207_v26, %v142_v32 }
 0x246   :  { %v151_v35 = vsel %vm148_vm5, %v150_v33, %v146_v34 }
 0x247   :  { %v153_v36 = vmul.f32 %v151_v35, %v279_v14 }
 0x249   :  { %v154_v37 = vsel %vm24_vm0, %v153_v36, 0.0 }
 0x24a   :  { %155 = vadd.xlane.f32.xlu1 %v154_v37 }
 0x2bd   :  { %v156_v38 = vpop.xlane.xlu1 %155 }
 0x2be   :  { %208 = vrcp.f32 %v156_v38  ;;  %v168_v42 = vand.u32 2147483648, %v156_v38  ;;  %v166_v44 = vand.u32 2147483647, %v156_v38  ;;  %vm162_vm7 = vweird.f32 %v156_v38 }
 0x2c0   :  { %v169_v46 = vor.u32 1.1754944e-38, %v168_v42  ;;  %vm167_vm9 = vcmp.eq.f32.partialorder %v166_v44, 8.507059e+37 }
 0x2c4   :  { %v209_v39 = vpop.eup %208 }
 0x2c5   :  { %v158_v40 = vmul.f32 %v209_v39, %v156_v38  ;;  %vm163_vm6 = vweird.f32 %v209_v39 }
 0x2c6   :  { %vm164_vm8 = vmor %vm162_vm7, %vm163_vm6 }
 0x2c7   :  { %v159_v41 = vsub.f32 1.0, %v158_v40 }
 0x2c9   :  { %v160_v43 = vmul.f32 %v209_v39, %v159_v41 }
 0x2cb   :  { %v161_v45 = vadd.f32 %v209_v39, %v160_v43 }
 0x2cd   :  { %v165_v47 = vsel %vm164_vm8, %v209_v39, %v161_v45 }
 0x2ce   :  { %v170_v48 = vsel %vm167_vm9, %v169_v46, %v165_v47 }
 0x2cf   :  { %v172_v49 = vmul.f32 %v170_v48, %v279_v14 }
 0x2d1   :  { %v173_v50 = vmul.f32 %v172_v49, %v151_v35 }
 0x2d3   :  { %174 = vst.msk [vmem:[#allocation5] sm:$0xff] %vm24_vm0, %v173_v50 }
 0x2d4   :  { %185 = dma.vmem_to_hbm [thread:$0]  %s181_s12, 128, %s183_s15, [#allocation4]  }
 0x2d5   :  { %260 = dma.done.wait [#allocation4], 128  }
 0x2d6   :  { %261 = vsyncadd [#allocation4], 4294967168 }
 0x2d7   :  { %190 = vsyncpa [#allocation3], 1 }
 0x2d8   :  { %191 = vsyncpa [#allocation4], 1 }

</bundles_post_ra>
